<compile_context>
chip_gen: v6e
topology: v6e:2x2x1
jax: 0.10.0
libtpu: 0.0.40
codegen_flags: <defaults>
</compile_context>

<pallas_src>
import functools

import jax
import jax.numpy as jnp
from jax.experimental import pallas as pl
from jax.experimental.pallas import tpu as pltpu


HIDDEN = 128
LANE = 128
SUBLANE = 8


def _round_up(x, m):
    return ((x + m - 1) // m) * m


def _pad2(a, rows, cols, dtype):
    """Cast to dtype and zero-pad a 2-D array to (rows, cols)."""
    r, c = a.shape
    a = a.astype(dtype)
    if r == rows and c == cols:
        return a
    return jnp.pad(a, ((0, rows - r), (0, cols - c)))


def _dqn_kernel(x_ref, w1_ref, b1_ref, w2_ref, b2_ref, w3_ref, b3_ref, o_ref):
    """Fused forward: relu(x@W1+b1) -> relu(@W2+b2) -> @W3+b3.

    Matmuls run on the MXU with f32 accumulation; bias add + ReLU in f32;
    activations are cast back to the weight dtype (bf16) between layers.
    """
    x = x_ref[...]
    h1 = jnp.dot(x, w1_ref[...], preferred_element_type=jnp.float32) + b1_ref[...]
    h1 = jnp.maximum(h1, 0.0).astype(w2_ref.dtype)
    h2 = jnp.dot(h1, w2_ref[...], preferred_element_type=jnp.float32) + b2_ref[...]
    h2 = jnp.maximum(h2, 0.0).astype(w3_ref.dtype)
    out = jnp.dot(h2, w3_ref[...], preferred_element_type=jnp.float32) + b3_ref[...]
    o_ref[...] = out.astype(o_ref.dtype)


@functools.partial(jax.jit, static_argnames=("block_b", "compute_dtype"))
def dqn_forward(x, params, *, block_b=None, compute_dtype=jnp.bfloat16):
    """Runs the fused DQN forward pass as a Pallas kernel.

    x: (B, input_dim) float32
    params: dict with w1 (D_in,128), b1 (1,128), w2 (128,128), b2 (1,128),
            w3 (128, D_out), b3 (1, D_out)
    block_b: batch tile (auto: min(512, round_up(B, 8)))
    compute_dtype: matmul operand dtype (bf16 default; f32 accumulation always)
    """
    w1, b1 = params["w1"], params["b1"]
    w2, b2 = params["w2"], params["b2"]
    w3, b3 = params["w3"], params["b3"]

    batch, in_dim = x.shape
    out_dim = w3.shape[1]

    # Lane-dense feature dims (pad to multiples of 128).
    in_p = _round_up(in_dim, LANE)
    out_p = _round_up(out_dim, LANE)

    # Batch tile: big enough to fill the MXU M dimension and amortize the
    # per-grid-step overhead; capped at 512 (keeps >= 2 parallel grid steps
    # for the two v7x TensorCores whenever batch > 512, and VMEM usage far
    # below v7x's 64 MiB budget).
    if block_b is None:
        block_b = min(512, _round_up(batch, SUBLANE))
    block_b = _round_up(block_b, SUBLANE)
    batch_p = _round_up(batch, block_b)
    grid = (pl.cdiv(batch_p, block_b),)

    # Pad + cast once in the wrapper (outside the kernel). Zero-padded x cols /
    # W1 rows / W3 cols / b3 cols do not change the valid outputs.
    f32 = jnp.float32
    x_p = _pad2(x, batch_p, in_p, compute_dtype)
    w1_p = _pad2(w1, in_p, HIDDEN, compute_dtype)
    w2_p = _pad2(w2, HIDDEN, HIDDEN, compute_dtype)
    w3_p = _pad2(w3, HIDDEN, out_p, compute_dtype)
    b1_p = _pad2(b1, 1, HIDDEN, f32)
    b2_p = _pad2(b2, 1, HIDDEN, f32)
    b3_p = _pad2(b3, 1, out_p, f32)

    # Weights/biases: constant block index => resident in VMEM, no re-DMA
    # across batch tiles. Only x / out are tiled along the batch axis.
    in_specs = [
        pl.BlockSpec((block_b, in_p), lambda i: (i, 0)),     # x tile
        pl.BlockSpec((in_p, HIDDEN), lambda i: (0, 0)),      # W1
        pl.BlockSpec((1, HIDDEN), lambda i: (0, 0)),         # b1
        pl.BlockSpec((HIDDEN, HIDDEN), lambda i: (0, 0)),    # W2
        pl.BlockSpec((1, HIDDEN), lambda i: (0, 0)),         # b2
        pl.BlockSpec((HIDDEN, out_p), lambda i: (0, 0)),     # W3
        pl.BlockSpec((1, out_p), lambda i: (0, 0)),          # b3
    ]
    out_specs = pl.BlockSpec((block_b, out_p), lambda i: (i, 0))

    # Advisory cost for XLA's scheduler.
    flops = 2 * batch_p * (in_p * HIDDEN + HIDDEN * HIDDEN + HIDDEN * out_p)
    bytes_accessed = sum(
        int(a.size) * int(a.dtype.itemsize)
        for a in (x_p, w1_p, b1_p, w2_p, b2_p, w3_p, b3_p)
    ) + batch_p * out_p * 4

    out_padded = pl.pallas_call(
        _dqn_kernel,
        out_shape=jax.ShapeDtypeStruct((batch_p, out_p), jnp.float32),
        grid_spec=pltpu.PrefetchScalarGridSpec(
            num_scalar_prefetch=0,
            grid=grid,
            in_specs=in_specs,
            out_specs=out_specs,
        ),
        compiler_params=pltpu.CompilerParams(
            dimension_semantics=("parallel",),
        ),
        cost_estimate=pl.CostEstimate(
            flops=int(flops), transcendentals=0, bytes_accessed=int(bytes_accessed)
        ),
    )(x_p, w1_p, b1_p, w2_p, b2_p, w3_p, b3_p)

    # Strip batch / output-feature padding.
    return out_padded[:batch, :out_dim]


def init_dqn_params(key, input_dim, output_dim):
    """Deterministic init mimicking nn.Linear default (U[-1/sqrt(fan_in), +])."""
    ks = jax.random.split(key, 6)

    def linear(kw, kb, fan_in, fan_out):
        bound = 1.0 / jnp.sqrt(jnp.float32(fan_in))
        w = jax.random.uniform(kw, (fan_in, fan_out), jnp.float32, -bound, bound)
        b = jax.random.uniform(kb, (1, fan_out), jnp.float32, -bound, bound)
        return w, b

    w1, b1 = linear(ks[0], ks[1], input_dim, HIDDEN)
    w2, b2 = linear(ks[2], ks[3], HIDDEN, HIDDEN)
    w3, b3 = linear(ks[4], ks[5], HIDDEN, output_dim)
    return {"w1": w1, "b1": b1, "w2": w2, "b2": b2, "w3": w3, "b3": b3}


def dqn_forward_ref(x, p, compute_dtype=jnp.float32):
    """Pure-JAX reference of the PyTorch forward (matching compute dtype)."""
    cd = compute_dtype
    h1 = jnp.dot(x.astype(cd), p["w1"].astype(cd),
                 preferred_element_type=jnp.float32) + p["b1"]
    h1 = jnp.maximum(h1, 0.0)
    h2 = jnp.dot(h1.astype(cd), p["w2"].astype(cd),
                 preferred_element_type=jnp.float32) + p["b2"]
    h2 = jnp.maximum(h2, 0.0)
    return jnp.dot(h2.astype(cd), p["w3"].astype(cd),
                   preferred_element_type=jnp.float32) + p["b3"]


if __name__ == "__main__":
    key = jax.random.PRNGKey(0)
    k_params, k_x1, k_x2 = jax.random.split(key, 3)

    input_dim, output_dim = 16, 4
    params = init_dqn_params(k_params, input_dim, output_dim)

    # --- test 1: small batch, exact f32 path ---------------------------------
    batch = 8
    x = jax.random.normal(k_x1, (batch, input_dim), jnp.float32)

    out_f32 = jax.block_until_ready(
        dqn_forward(x, params, compute_dtype=jnp.float32))
    ref_f32 = dqn_forward_ref(x, params, jnp.float32)
    assert out_f32.shape == (batch, output_dim)
    assert jnp.allclose(out_f32, ref_f32, atol=1e-5, rtol=1e-5), "f32 mismatch"

    # default bf16 compute path (compare vs bf16-matched reference)
    out_bf16 = jax.block_until_ready(dqn_forward(x, params))
    ref_bf16 = dqn_forward_ref(x, params, jnp.bfloat16)
    assert jnp.allclose(out_bf16, ref_bf16, atol=1e-3, rtol=1e-3), "bf16 mismatch"

    # --- test 2: non-multiple batch, multi-step grid (exercises padding) -----
    batch2 = 50
    x2 = jax.random.normal(k_x2, (batch2, input_dim), jnp.float32)
    out2 = jax.block_until_ready(dqn_forward(x2, params, block_b=16))
    ref2 = dqn_forward_ref(x2, params, jnp.bfloat16)
    assert out2.shape == (batch2, output_dim)
    assert jnp.allclose(out2, ref2, atol=1e-3, rtol=1e-3), "tail-pad mismatch"

    print("KERNEL_OK")
</pallas_src>

<mosaic_0001>
module attributes {stable_mosaic.version = 11 : i64} {
  func.func @_dqn_kernel(%arg0: i32, %arg1: memref<8x128xf32, #tpu.memory_space<vmem>>, %arg2: memref<128x128xf32, #tpu.memory_space<vmem>>, %arg3: memref<1x128xf32, #tpu.memory_space<vmem>>, %arg4: memref<128x128xf32, #tpu.memory_space<vmem>>, %arg5: memref<1x128xf32, #tpu.memory_space<vmem>>, %arg6: memref<128x128xf32, #tpu.memory_space<vmem>>, %arg7: memref<1x128xf32, #tpu.memory_space<vmem>>, %arg8: memref<8x128xf32, #tpu.memory_space<vmem>>) attributes {dimension_semantics = [#tpu.dimension_semantics<parallel>], iteration_bounds = array<i64: 1>, scalar_prefetch = 0 : i64, scratch_operands = 0 : i64, tpu.core_type = #tpu.core_type<tc>, window_params = [{transform_indices = @transform_0, window_bounds = array<i64: 8, 128>}, {pipeline_mode = #tpu.pipeline_mode<synchronous>, transform_indices = @transform_1, window_bounds = array<i64: 128, 128>}, {pipeline_mode = #tpu.pipeline_mode<synchronous>, transform_indices = @transform_2, window_bounds = array<i64: 1, 128>}, {pipeline_mode = #tpu.pipeline_mode<synchronous>, transform_indices = @transform_3, window_bounds = array<i64: 128, 128>}, {pipeline_mode = #tpu.pipeline_mode<synchronous>, transform_indices = @transform_4, window_bounds = array<i64: 1, 128>}, {pipeline_mode = #tpu.pipeline_mode<synchronous>, transform_indices = @transform_5, window_bounds = array<i64: 128, 128>}, {pipeline_mode = #tpu.pipeline_mode<synchronous>, transform_indices = @transform_6, window_bounds = array<i64: 1, 128>}, {transform_indices = @transform_7, window_bounds = array<i64: 8, 128>}]} {
    %c0 = arith.constant 0 : index
    %c0_0 = arith.constant 0 : index
    %0 = vector.load %arg1[%c0, %c0_0] : memref<8x128xf32, #tpu.memory_space<vmem>>, vector<8x128xf32>
    %c0_1 = arith.constant 0 : index
    %c0_2 = arith.constant 0 : index
    %1 = vector.load %arg2[%c0_1, %c0_2] : memref<128x128xf32, #tpu.memory_space<vmem>>, vector<128x128xf32>
    %cst = arith.constant dense<0.000000e+00> : vector<8x128xf32>
    %2 = tpu.matmul %0, %1, %cst {dimension_numbers = #tpu.dot_dimension_numbers<[1], [0], [0], [1], [0, 0, 1, 1], [], []>} : vector<8x128xf32>, vector<128x128xf32>, vector<8x128xf32> -> vector<8x128xf32>
    %c0_3 = arith.constant 0 : index
    %c0_4 = arith.constant 0 : index
    %3 = vector.load %arg3[%c0_3, %c0_4] : memref<1x128xf32, #tpu.memory_space<vmem>>, vector<1x128xf32>
    %4 = vector.broadcast %3 : vector<1x128xf32> to vector<8x128xf32>
    %5 = arith.addf %2, %4 : vector<8x128xf32>
    %cst_5 = arith.constant 0.000000e+00 : f32
    %6 = vector.broadcast %cst_5 : f32 to vector<8x128xf32>
    %7 = arith.maximumf %5, %6 : vector<8x128xf32>
    %c0_6 = arith.constant 0 : index
    %c0_7 = arith.constant 0 : index
    %8 = vector.load %arg4[%c0_6, %c0_7] : memref<128x128xf32, #tpu.memory_space<vmem>>, vector<128x128xf32>
    %cst_8 = arith.constant dense<0.000000e+00> : vector<8x128xf32>
    %9 = tpu.matmul %7, %8, %cst_8 {dimension_numbers = #tpu.dot_dimension_numbers<[1], [0], [0], [1], [0, 0, 1, 1], [], []>} : vector<8x128xf32>, vector<128x128xf32>, vector<8x128xf32> -> vector<8x128xf32>
    %c0_9 = arith.constant 0 : index
    %c0_10 = arith.constant 0 : index
    %10 = vector.load %arg5[%c0_9, %c0_10] : memref<1x128xf32, #tpu.memory_space<vmem>>, vector<1x128xf32>
    %11 = vector.broadcast %10 : vector<1x128xf32> to vector<8x128xf32>
    %12 = arith.addf %9, %11 : vector<8x128xf32>
    %cst_11 = arith.constant 0.000000e+00 : f32
    %13 = vector.broadcast %cst_11 : f32 to vector<8x128xf32>
    %14 = arith.maximumf %12, %13 : vector<8x128xf32>
    %c0_12 = arith.constant 0 : index
    %c0_13 = arith.constant 0 : index
    %15 = vector.load %arg6[%c0_12, %c0_13] : memref<128x128xf32, #tpu.memory_space<vmem>>, vector<128x128xf32>
    %cst_14 = arith.constant dense<0.000000e+00> : vector<8x128xf32>
    %16 = tpu.matmul %14, %15, %cst_14 {dimension_numbers = #tpu.dot_dimension_numbers<[1], [0], [0], [1], [0, 0, 1, 1], [], []>} : vector<8x128xf32>, vector<128x128xf32>, vector<8x128xf32> -> vector<8x128xf32>
    %c0_15 = arith.constant 0 : index
    %c0_16 = arith.constant 0 : index
    %17 = vector.load %arg7[%c0_15, %c0_16] : memref<1x128xf32, #tpu.memory_space<vmem>>, vector<1x128xf32>
    %18 = vector.broadcast %17 : vector<1x128xf32> to vector<8x128xf32>
    %19 = arith.addf %16, %18 : vector<8x128xf32>
    %c0_17 = arith.constant 0 : index
    %c0_18 = arith.constant 0 : index
    %20 = vector.load %arg8[%c0_17, %c0_18] : memref<8x128xf32, #tpu.memory_space<vmem>>, vector<8x128xf32>
    tpu.vector_store %arg8[%c0_17, %c0_18], %19 {strides = array<i32>} : memref<8x128xf32, #tpu.memory_space<vmem>>, vector<8x128xf32>,
    return
  }
  func.func @transform_0(%arg0: i32) -> (i32, i32) {
    %c0_i32 = arith.constant 0 : i32
    %c0_i32_0 = arith.constant 0 : i32
    return %arg0, %c0_i32 : i32, i32
  }
  func.func @transform_1(%arg0: i32) -> (i32, i32) {
    %c0_i32 = arith.constant 0 : i32
    %c0_i32_0 = arith.constant 0 : i32
    %c0_i32_1 = arith.constant 0 : i32
    return %c0_i32, %c0_i32_0 : i32, i32
  }
  func.func @transform_2(%arg0: i32) -> (i32, i32) {
    %c0_i32 = arith.constant 0 : i32
    %c0_i32_0 = arith.constant 0 : i32
    %c0_i32_1 = arith.constant 0 : i32
    return %c0_i32, %c0_i32_0 : i32, i32
  }
  func.func @transform_3(%arg0: i32) -> (i32, i32) {
    %c0_i32 = arith.constant 0 : i32
    %c0_i32_0 = arith.constant 0 : i32
    %c0_i32_1 = arith.constant 0 : i32
    return %c0_i32, %c0_i32_0 : i32, i32
  }
  func.func @transform_4(%arg0: i32) -> (i32, i32) {
    %c0_i32 = arith.constant 0 : i32
    %c0_i32_0 = arith.constant 0 : i32
    %c0_i32_1 = arith.constant 0 : i32
    return %c0_i32, %c0_i32_0 : i32, i32
  }
  func.func @transform_5(%arg0: i32) -> (i32, i32) {
    %c0_i32 = arith.constant 0 : i32
    %c0_i32_0 = arith.constant 0 : i32
    %c0_i32_1 = arith.constant 0 : i32
    return %c0_i32, %c0_i32_0 : i32, i32
  }
  func.func @transform_6(%arg0: i32) -> (i32, i32) {
    %c0_i32 = arith.constant 0 : i32
    %c0_i32_0 = arith.constant 0 : i32
    %c0_i32_1 = arith.constant 0 : i32
    return %c0_i32, %c0_i32_0 : i32, i32
  }
  func.func @transform_7(%arg0: i32) -> (i32, i32) {
    %c0_i32 = arith.constant 0 : i32
    %c0_i32_0 = arith.constant 0 : i32
    return %arg0, %c0_i32 : i32, i32
  }
}

</mosaic_0001>

<bundles_post_ra>
// kernel: dqn_forward.1
= control target key start
LH: loop header
LB: loop body
LE: loop exit
PB: predicated region body
PF: predicated region fallthrough
CT: control target
= control target key end

     0   :  { %v474_v0 = vmov 0.0   ;;  %vm475_vm0 = vmmov 0   ;;  %s729_s1 = inlined_call_operand.vmem [shape: f32[128,128], index: 1, kind: input, shape index: {}]   ;;  %s730_s3 = inlined_call_operand.vmem [shape: f32[128,128], index: 3, kind: input, shape index: {}]   ;;  %s731_s0 = inlined_call_operand.vmem [shape: f32[8,128], index: 0, kind: input, shape index: {}]   ;;  %s732_s5 = inlined_call_operand.vmem [shape: f32[128,128], index: 5, kind: input, shape index: {}]   ;;  %s733_s2 = inlined_call_operand.vmem [shape: f32[1,128], index: 2, kind: input, shape index: {}]   ;;  %s734_s4 = inlined_call_operand.vmem [shape: f32[1,128], index: 4, kind: input, shape index: {}]   ;;  %s735_s6 = inlined_call_operand.vmem [shape: f32[1,128], index: 6, kind: input, shape index: {}]   ;;  %s736_s7 = inlined_call_operand.vmem [shape: f32[8,128], index: 7, kind: output, shape index: {}]  }
   0x1   :  { %367 = vmatprep.subr.mxu0 %v474_v0  ;;  %v42_v1 = vld [vmem:[%s729_s1 + $0x78] sm:$0xff]  ;;  %v41_v2 = vld [vmem:[%s729_s1 + $0x70] sm:$0xff]  ;;  %399 = vmatprep.mubr.msk.f32.mxu0 %vm475_vm0, %v474_v0  ;;  %v40_v3 = vld [vmem:[%s729_s1 + $0x68] sm:$0xff] }
   0x2   :  { %368 = vmatpush3.msra.mxu0 %v42_v1  ;;  %402 = vmatprep.subr.mxu1 %v474_v0  ;;  %v39_v4 = vld [vmem:[%s729_s1 + $0x60] sm:$0xff]  ;;  %v136_v5 = vld [vmem:[%s730_s3 + $0x78] sm:$0xff]  ;;  %v135_v7 = vld [vmem:[%s730_s3 + $0x70] sm:$0xff] }
   0x3   :  { %369 = vmatprep.subr.mxu0 %v474_v0  ;;  %434 = vmatprep.mubr.msk.f32.mxu1 %vm475_vm0, %v474_v0  ;;  %v38_v6 = vld [vmem:[%s729_s1 + $0x58] sm:$0xff]  ;;  %v134_v8 = vld [vmem:[%s730_s3 + $0x68] sm:$0xff]  ;;  %v37_v9 = vld [vmem:[%s729_s1 + $0x50] sm:$0xff] }
   0x4   :  { %370 = vmatpush3.msra.mxu0 %v41_v2  ;;  %403 = vmatpush3.msra.mxu1 %v136_v5  ;;  %v133_v10 = vld [vmem:[%s730_s3 + $0x60] sm:$0xff]  ;;  %v36_v11 = vld [vmem:[%s729_s1 + $0x48] sm:$0xff]  ;;  %v132_v12 = vld [vmem:[%s730_s3 + $0x58] sm:$0xff] }
   0x5   :  { %371 = vmatprep.subr.mxu0 %v474_v0  ;;  %404 = vmatprep.subr.mxu1 %v474_v0  ;;  %v35_v13 = vld [vmem:[%s729_s1 + $0x40] sm:$0xff]  ;;  %v131_v14 = vld [vmem:[%s730_s3 + $0x50] sm:$0xff]  ;;  %v34_v15 = vld [vmem:[%s729_s1 + $0x38] sm:$0xff] }
   0x6   :  { %372 = vmatpush3.msra.mxu0 %v40_v3  ;;  %405 = vmatpush3.msra.mxu1 %v135_v7  ;;  %v130_v16 = vld [vmem:[%s730_s3 + $0x48] sm:$0xff]  ;;  %v33_v17 = vld [vmem:[%s729_s1 + $0x30] sm:$0xff]  ;;  %v129_v18 = vld [vmem:[%s730_s3 + $0x40] sm:$0xff] }
   0x7   :  { %373 = vmatprep.subr.mxu0 %v474_v0  ;;  %406 = vmatprep.subr.mxu1 %v474_v0  ;;  %v32_v19 = vld [vmem:[%s729_s1 + $0x28] sm:$0xff]  ;;  %v128_v20 = vld [vmem:[%s730_s3 + $0x38] sm:$0xff]  ;;  %v31_v21 = vld [vmem:[%s729_s1 + $0x20] sm:$0xff] }
   0x8   :  { %374 = vmatpush3.msra.mxu0 %v39_v4  ;;  %407 = vmatpush3.msra.mxu1 %v134_v8  ;;  %v127_v22 = vld [vmem:[%s730_s3 + $0x30] sm:$0xff]  ;;  %v30_v23 = vld [vmem:[%s729_s1 + $0x18] sm:$0xff]  ;;  %v126_v24 = vld [vmem:[%s730_s3 + $0x28] sm:$0xff] }
   0x9   :  { %375 = vmatprep.subr.mxu0 %v474_v0  ;;  %408 = vmatprep.subr.mxu1 %v474_v0  ;;  %v29_v25 = vld [vmem:[%s729_s1 + $0x10] sm:$0xff]  ;;  %v125_v26 = vld [vmem:[%s730_s3 + $0x20] sm:$0xff]  ;;  %v28_v27 = vld [vmem:[%s729_s1 + $0x8] sm:$0xff] }
   0xa   :  { %376 = vmatpush3.msra.mxu0 %v38_v6  ;;  %409 = vmatpush3.msra.mxu1 %v133_v10  ;;  %v124_v28 = vld [vmem:[%s730_s3 + $0x18] sm:$0xff]  ;;  %v27_v29 = vld [vmem:[%s729_s1] sm:$0xff]  ;;  %v123_v31 = vld [vmem:[%s730_s3 + $0x10] sm:$0xff] }
   0xb   :  { %377 = vmatprep.subr.mxu0 %v474_v0  ;;  %410 = vmatprep.subr.mxu1 %v474_v0  ;;  %v26_v30 = vld [vmem:[%s731_s0] sm:$0xff]  ;;  %v122_v32 = vld [vmem:[%s730_s3 + $0x8] sm:$0xff]  ;;  %v230_v34 = vld [vmem:[%s732_s5 + $0x78] sm:$0xff] }
   0xc   :  { %378 = vmatpush3.msra.mxu0 %v37_v9  ;;  %411 = vmatpush3.msra.mxu1 %v132_v12  ;;  %v121_v33 = vld [vmem:[%s730_s3] sm:$0xff]  ;;  %v229_v35 = vld [vmem:[%s732_s5 + $0x70] sm:$0xff]  ;;  %v228_v36 = vld [vmem:[%s732_s5 + $0x68] sm:$0xff] }
   0xd   :  { %379 = vmatprep.subr.mxu0 %v474_v0  ;;  %412 = vmatprep.subr.mxu1 %v474_v0  ;;  %v227_v37 = vld [vmem:[%s732_s5 + $0x60] sm:$0xff]  ;;  %v226_v38 = vld [vmem:[%s732_s5 + $0x58] sm:$0xff]  ;;  %v225_v39 = vld [vmem:[%s732_s5 + $0x50] sm:$0xff] }
   0xe   :  { %380 = vmatpush3.msra.mxu0 %v36_v11  ;;  %413 = vmatpush3.msra.mxu1 %v131_v14  ;;  %v224_v40 = vld [vmem:[%s732_s5 + $0x48] sm:$0xff]  ;;  %v223_v41 = vld [vmem:[%s732_s5 + $0x40] sm:$0xff]  ;;  %v222_v42 = vld [vmem:[%s732_s5 + $0x38] sm:$0xff] }
   0xf   :  { %381 = vmatprep.subr.mxu0 %v474_v0  ;;  %414 = vmatprep.subr.mxu1 %v474_v0  ;;  %v221_v43 = vld [vmem:[%s732_s5 + $0x30] sm:$0xff]  ;;  %v220_v44 = vld [vmem:[%s732_s5 + $0x28] sm:$0xff]  ;;  %v219_v45 = vld [vmem:[%s732_s5 + $0x20] sm:$0xff] }
  0x10   :  { %382 = vmatpush3.msra.mxu0 %v35_v13  ;;  %415 = vmatpush3.msra.mxu1 %v130_v16  ;;  %v218_v46 = vld [vmem:[%s732_s5 + $0x18] sm:$0xff]  ;;  %v313_v47 = vld [vmem:[%s733_s2] ss:$0 sm:$0xff]  ;;  %v217_v52 = vld [vmem:[%s732_s5 + $0x10] sm:$0xff] }
  0x11   :  { %383 = vmatprep.subr.mxu0 %v474_v0  ;;  %416 = vmatprep.subr.mxu1 %v474_v0  ;;  %v216_v53 = vld [vmem:[%s732_s5 + $0x8] sm:$0xff]  ;;  %v215_v54 = vld [vmem:[%s732_s5] sm:$0xff] }
  0x12   :  { %384 = vmatpush3.msra.mxu0 %v34_v15  ;;  %417 = vmatpush3.msra.mxu1 %v129_v18  ;;  %v314_v55 = vld [vmem:[%s734_s4] ss:$0 sm:$0xff] }
  0x13   :  { %385 = vmatprep.subr.mxu0 %v474_v0  ;;  %418 = vmatprep.subr.mxu1 %v474_v0  ;;  %v315_v60 = vld [vmem:[%s735_s6] ss:$0 sm:$0xff] }
  0x14   :  { %386 = vmatpush3.msra.mxu0 %v33_v17  ;;  %419 = vmatpush3.msra.mxu1 %v128_v20 }
  0x15   :  { %387 = vmatprep.subr.mxu0 %v474_v0  ;;  %420 = vmatprep.subr.mxu1 %v474_v0 }
  0x16   :  { %388 = vmatpush3.msra.mxu0 %v32_v19  ;;  %421 = vmatpush3.msra.mxu1 %v127_v22 }
  0x17   :  { %389 = vmatprep.subr.mxu0 %v474_v0  ;;  %422 = vmatprep.subr.mxu1 %v474_v0 }
  0x18   :  { %390 = vmatpush3.msra.mxu0 %v31_v21  ;;  %423 = vmatpush3.msra.mxu1 %v126_v24 }
  0x19   :  { %391 = vmatprep.subr.mxu0 %v474_v0  ;;  %424 = vmatprep.subr.mxu1 %v474_v0 }
  0x1a   :  { %392 = vmatpush3.msra.mxu0 %v30_v23  ;;  %425 = vmatpush3.msra.mxu1 %v125_v26 }
  0x1b   :  { %393 = vmatprep.subr.mxu0 %v474_v0  ;;  %426 = vmatprep.subr.mxu1 %v474_v0 }
  0x1c   :  { %394 = vmatpush3.msra.mxu0 %v29_v25  ;;  %427 = vmatpush3.msra.mxu1 %v124_v28 }
  0x1d   :  { %395 = vmatprep.subr.mxu0 %v474_v0  ;;  %428 = vmatprep.subr.mxu1 %v474_v0 }
  0x1e   :  { %396 = vmatpush3.msra.mxu0 %v28_v27  ;;  %429 = vmatpush3.msra.mxu1 %v123_v31 }
  0x1f   :  { %397 = vmatprep.subr.mxu0 %v474_v0  ;;  %430 = vmatprep.subr.mxu1 %v474_v0 }
  0x20   :  { %398 = vmatpush3.msra.mxu0 %v27_v29  ;;  %431 = vmatpush3.msra.mxu1 %v122_v32 }
  0x21   :  { %400 = vmatmul.mubr.f32.vlgmr.msra.gmra.mxu0 %v26_v30  ;;  %437 = vmatprep.subr.mxu0 %v474_v0 }
  0x22   :  { %469 = vmatprep.mubr.msk.f32.mxu0 %vm475_vm0, %v474_v0  ;;  %432 = vmatprep.subr.mxu1 %v474_v0 }
  0x23   :  { %433 = vmatpush3.msra.mxu1 %v121_v33  ;;  %438 = vmatpush3.msra.mxu0 %v230_v34 }
  0x24   :  { %439 = vmatprep.subr.mxu0 %v474_v0 }
  0x25   :  { %440 = vmatpush3.msra.mxu0 %v229_v35 }
  0x26   :  { %441 = vmatprep.subr.mxu0 %v474_v0 }
  0x27   :  { %442 = vmatpush3.msra.mxu0 %v228_v36 }
  0x28   :  { %443 = vmatprep.subr.mxu0 %v474_v0 }
  0x29   :  { %444 = vmatpush3.msra.mxu0 %v227_v37 }
  0x2a   :  { %445 = vmatprep.subr.mxu0 %v474_v0 }
  0x2b   :  { %446 = vmatpush3.msra.mxu0 %v226_v38 }
  0x2c   :  { %447 = vmatprep.subr.mxu0 %v474_v0 }
  0x2d   :  { %448 = vmatpush3.msra.mxu0 %v225_v39 }
  0x2e   :  { %449 = vmatprep.subr.mxu0 %v474_v0 }
  0x2f   :  { %450 = vmatpush3.msra.mxu0 %v224_v40 }
  0x30   :  { %451 = vmatprep.subr.mxu0 %v474_v0 }
  0x31   :  { %452 = vmatpush3.msra.mxu0 %v223_v41 }
  0x32   :  { %453 = vmatprep.subr.mxu0 %v474_v0 }
  0x33   :  { %454 = vmatpush3.msra.mxu0 %v222_v42 }
  0x34   :  { %455 = vmatprep.subr.mxu0 %v474_v0 }
  0x35   :  { %456 = vmatpush3.msra.mxu0 %v221_v43 }
  0x36   :  { %457 = vmatprep.subr.mxu0 %v474_v0 }
  0x37   :  { %458 = vmatpush3.msra.mxu0 %v220_v44 }
  0x38   :  { %459 = vmatprep.subr.mxu0 %v474_v0 }
  0x39   :  { %460 = vmatpush3.msra.mxu0 %v219_v45 }
  0x3a   :  { %461 = vmatprep.subr.mxu0 %v474_v0 }
  0x3b   :  { %462 = vmatpush3.msra.mxu0 %v218_v46 }
  0x3c   :  { %463 = vmatprep.subr.mxu0 %v474_v0 }
  0x3d   :  { %464 = vmatpush3.msra.mxu0 %v217_v52 }
  0x3e   :  { %465 = vmatprep.subr.mxu0 %v474_v0 }
  0x3f   :  { %466 = vmatpush3.msra.mxu0 %v216_v53 }
  0x40   :  { %467 = vmatprep.subr.mxu0 %v474_v0 }
  0x41   :  { %468 = vmatpush3.msra.mxu0 %v215_v54 }
  0xe1   :  { %v116_v48 = vpop.f32.mrf.mxu0 }
  0xe2   :  { %v117_v49 = vadd.f32 %v313_v47, %v116_v48 }
  0xe3   :  { %v401_v50 = vpop.f32.mrf.mxu0 }
  0xe4   :  { %v120_v51 = vmax.f32 %v117_v49, 0.0 }
  0xe6   :  { %435 = vmatmul.mubr.f32.vlgmr.msra.gmra.mxu1 %v120_v51 }
 0x1a6   :  { %v210_v56 = vpop.f32.mrf.mxu1 }
 0x1a7   :  { %v211_v57 = vadd.f32 %v314_v55, %v210_v56 }
 0x1a8   :  { %v436_v58 = vpop.f32.mrf.mxu1 }
 0x1a9   :  { %v214_v59 = vmax.f32 %v211_v57, 0.0 }
 0x1ab   :  { %470 = vmatmul.mubr.f32.vlgmr.msra.gmra.mxu0 %v214_v59 }
 0x26b   :  { %v304_v61 = vpop.f32.mrf.mxu0 }
 0x26c   :  { %v305_v62 = vadd.f32 %v315_v60, %v304_v61 }
 0x26d   :  { %v471_v63 = vpop.f32.mrf.mxu0 }
 0x26e   :  { %308 = vst [vmem:[%s736_s7] sm:$0xff] %v305_v62 }

</bundles_post_ra>
